<compile_context>
chip_gen: v6e
topology: v6e:2x2x1
jax: 0.10.0
libtpu: 0.0.40
codegen_flags: <defaults>
</compile_context>

<pallas_src>
import functools

import jax
import jax.numpy as jnp
from jax.experimental import pallas as pl
from jax.experimental.pallas import tpu as pltpu

LANES = 128
SUBLANES = 8
MAX_TILE_ROWS = 4096      # (4096, 128) f32 = 2 MiB per input block


def _ftl_kernel(x_ref, t_ref, out_ref, *, tile_rows):
    k = pl.program_id(0)

    @pl.when(k == 0)
    def _init():
        out_ref[...] = jnp.zeros_like(out_ref)

    x = x_ref[...].astype(jnp.float32)          # (tile_rows, LANES)
    t = t_ref[...].astype(jnp.float32)
    p = 0.5 * (jnp.tanh(0.5 * x) + 1.0)         # == sigmoid(x), EUP

    def fold(v):
        # (tile_rows, LANES) -> (8, LANES): elementwise adds across vregs,
        # no cross-lane work inside the kernel.
        return jnp.sum(v.reshape(tile_rows // SUBLANES, SUBLANES, LANES),
                       axis=0)

    # Per-lane partial sums; fp/fn derived from sum(p)/sum(t) in the epilogue.
    out_ref[0] += fold(p * t)     # -> tp
    out_ref[1] += fold(p)         # -> sum(p)
    out_ref[2] += fold(t)         # -> sum(t)


def _sublane_multiple(dtype):
    # f32 -> 8, bf16/f16 -> 16, int8/fp8/bool -> 32 (sublane packing).
    return 32 // max(1, jnp.dtype(dtype).itemsize)


def focal_tversky_loss(inputs, targets, alpha=0.25, beta=0.75, gamma=2,
                       smooth=1.0):
    x = inputs.reshape(-1)
    t = targets.reshape(-1)
    n = x.shape[0]

    sub_mult = max(_sublane_multiple(x.dtype), _sublane_multiple(t.dtype))
    rows_avail = n // LANES
    rows_base = (rows_avail // sub_mult) * sub_mult

    if rows_base == 0:
        # Too small for even one tile: pure XLA path (not hit by the tests).
        p = jax.nn.sigmoid(x.astype(jnp.float32))
        tf = t.astype(jnp.float32)
        sums = jnp.stack([jnp.sum(p * tf), jnp.sum(p), jnp.sum(tf)])
    else:
        steps = pl.cdiv(rows_base, MAX_TILE_ROWS)
        tile_rows = ((rows_base // steps) // sub_mult) * sub_mult
        rows_used = steps * tile_rows
        n_main = rows_used * LANES

        # Lane-aligned prefix view (pure reshape when n % 128 == 0); the kernel
        # only touches the first rows_used rows, so no padding and no mask.
        x2 = x[:rows_avail * LANES].reshape(rows_avail, LANES)
        t2 = t[:rows_avail * LANES].reshape(rows_avail, LANES)

        kernel = functools.partial(_ftl_kernel, tile_rows=tile_rows)

        partials = pl.pallas_call(
            kernel,
            out_shape=jax.ShapeDtypeStruct((3, SUBLANES, LANES), jnp.float32),
            grid_spec=pltpu.PrefetchScalarGridSpec(
                num_scalar_prefetch=0,
                grid=(steps,),
                in_specs=[
                    pl.BlockSpec((tile_rows, LANES), lambda k: (k, 0)),
                    pl.BlockSpec((tile_rows, LANES), lambda k: (k, 0)),
                ],
                out_specs=pl.BlockSpec((3, SUBLANES, LANES),
                                       lambda k: (0, 0, 0)),
            ),
            compiler_params=pltpu.CompilerParams(
                dimension_semantics=("arbitrary",)),
            cost_estimate=pl.CostEstimate(
                flops=8 * n_main,
                transcendentals=n_main,
                bytes_accessed=(jnp.dtype(x.dtype).itemsize
                                + jnp.dtype(t.dtype).itemsize) * n_main
                               + 3 * SUBLANES * LANES * 4),
        )(x2, t2)

        sums = jnp.sum(partials, axis=(1, 2))        # [tp, sum(p), sum(t)]

        tail_n = n - n_main
        if tail_n > 0:
            # Ragged tail (< one tile + one lane-row): plain jnp, added here
            # instead of padding/masking the kernel's hot loop.
            xt = x[n_main:].astype(jnp.float32)
            tt = t[n_main:].astype(jnp.float32)
            pt = jax.nn.sigmoid(xt)
            sums = sums + jnp.stack(
                [jnp.sum(pt * tt), jnp.sum(pt), jnp.sum(tt)])

    tp = sums[0]
    fp = sums[1] - tp        # sum((1-t)*p)
    fn = sums[2] - tp        # sum(t*(1-p))
    tversky = (tp + smooth) / (tp + alpha * fp + beta * fn + smooth)
    return (1.0 - tversky) ** gamma


def _reference(inputs, targets, alpha=0.25, beta=0.75, gamma=2, smooth=1.0):
    p = jax.nn.sigmoid(inputs.astype(jnp.float32)).reshape(-1)
    t = targets.astype(jnp.float32).reshape(-1)
    tp = jnp.sum(p * t)
    fp = jnp.sum((1 - t) * p)
    fn = jnp.sum(t * (1 - p))
    tversky = (tp + smooth) / (tp + alpha * fp + beta * fn + smooth)
    return (1 - tversky) ** gamma


if __name__ == "__main__":
    key = jax.random.PRNGKey(0)
    k1, k2, k3, k4 = jax.random.split(key, 4)

    # NCHW, matching the PyTorch convention for segmentation logits / masks.
    inputs = jax.random.normal(k1, (2, 4, 16, 16), dtype=jnp.float32)
    targets = (jax.random.uniform(k2, (2, 4, 16, 16)) > 0.5).astype(jnp.float32)

    loss = jax.block_until_ready(focal_tversky_loss(inputs, targets))
    ref = _reference(inputs, targets)
    assert jnp.allclose(loss, ref, rtol=1e-4, atol=1e-6), (loss, ref)

    # Ragged size: exercises the aligned-prefix kernel + jnp tail path.
    n_ragged = 3 * 2048 + 517
    xr = jax.random.normal(k3, (n_ragged,), dtype=jnp.float32)
    tr = (jax.random.uniform(k4, (n_ragged,)) > 0.5).astype(jnp.float32)

    loss_r = jax.block_until_ready(focal_tversky_loss(xr, tr))
    ref_r = _reference(xr, tr)
    assert jnp.allclose(loss_r, ref_r, rtol=1e-4, atol=1e-6), (loss_r, ref_r)

    print("KERNEL_OK")
</pallas_src>

<mosaic_0001>
module attributes {stable_mosaic.version = 11 : i64} {
  func.func @_ftl_kernel(%arg0: i32, %arg1: memref<16x128xf32, #tpu.memory_space<vmem>>, %arg2: memref<16x128xf32, #tpu.memory_space<vmem>>, %arg3: memref<3x8x128xf32, #tpu.memory_space<vmem>>) attributes {dimension_semantics = [#tpu.dimension_semantics<arbitrary>], iteration_bounds = array<i64: 1>, scalar_prefetch = 0 : i64, scratch_operands = 0 : i64, tpu.core_type = #tpu.core_type<tc>, window_params = [{transform_indices = @transform_0, window_bounds = array<i64: 16, 128>}, {transform_indices = @transform_1, window_bounds = array<i64: 16, 128>}, {pipeline_mode = #tpu.pipeline_mode<synchronous>, transform_indices = @transform_2, window_bounds = array<i64: 3, 8, 128>}]} {
    %c0_i32 = arith.constant 0 : i32
    %0 = arith.cmpi eq, %arg0, %c0_i32 : i32
    %1 = arith.extui %0 : i1 to i32
    %c0_i32_0 = arith.constant 0 : i32
    %2 = arith.cmpi ne, %1, %c0_i32_0 : i32
    scf.if %2 {
      %cst_25 = arith.constant 0.000000e+00 : f32
      %37 = vector.broadcast %cst_25 : f32 to vector<3x8x128xf32>
      %c0_26 = arith.constant 0 : index
      %c0_27 = arith.constant 0 : index
      %c0_28 = arith.constant 0 : index
      %38 = vector.load %arg3[%c0_26, %c0_27, %c0_28] : memref<3x8x128xf32, #tpu.memory_space<vmem>>, vector<3x8x128xf32>
      tpu.vector_store %arg3[%c0_26, %c0_27, %c0_28], %37 {strides = array<i32>} : memref<3x8x128xf32, #tpu.memory_space<vmem>>, vector<3x8x128xf32>,
    } else {
    }
    %c0 = arith.constant 0 : index
    %c0_1 = arith.constant 0 : index
    %3 = vector.load %arg1[%c0, %c0_1] : memref<16x128xf32, #tpu.memory_space<vmem>>, vector<16x128xf32>
    %c0_2 = arith.constant 0 : index
    %c0_3 = arith.constant 0 : index
    %4 = vector.load %arg2[%c0_2, %c0_3] : memref<16x128xf32, #tpu.memory_space<vmem>>, vector<16x128xf32>
    %cst = arith.constant 5.000000e-01 : f32
    %5 = vector.broadcast %cst : f32 to vector<16x128xf32>
    %6 = arith.mulf %5, %3 : vector<16x128xf32>
    %7 = math.tanh %6 : vector<16x128xf32>
    %cst_4 = arith.constant 1.000000e+00 : f32
    %8 = vector.broadcast %cst_4 : f32 to vector<16x128xf32>
    %9 = arith.addf %7, %8 : vector<16x128xf32>
    %cst_5 = arith.constant 5.000000e-01 : f32
    %10 = vector.broadcast %cst_5 : f32 to vector<16x128xf32>
    %11 = arith.mulf %10, %9 : vector<16x128xf32>
    %c0_6 = arith.constant 0 : index
    %c0_7 = arith.constant 0 : index
    %c0_8 = arith.constant 0 : index
    %12 = vector.load %arg3[%c0_6, %c0_7, %c0_8] : memref<3x8x128xf32, #tpu.memory_space<vmem>>, vector<1x8x128xf32>
    %13 = vector.shape_cast %12 : vector<1x8x128xf32> to vector<8x128xf32>
    %14 = arith.mulf %11, %4 : vector<16x128xf32>
    %15 = vector.shape_cast %14 : vector<16x128xf32> to vector<2x8x128xf32>
    %cst_9 = arith.constant dense<0.000000e+00> : vector<8x128xf32>
    %16 = vector.multi_reduction <add>, %15, %cst_9 [0] : vector<2x8x128xf32> to vector<8x128xf32>
    %17 = arith.addf %13, %16 : vector<8x128xf32>
    %c0_10 = arith.constant 0 : index
    %c0_11 = arith.constant 0 : index
    %c0_12 = arith.constant 0 : index
    %18 = vector.load %arg3[%c0_10, %c0_11, %c0_12] : memref<3x8x128xf32, #tpu.memory_space<vmem>>, vector<1x8x128xf32>
    %19 = vector.shape_cast %18 : vector<1x8x128xf32> to vector<8x128xf32>
    %20 = vector.shape_cast %17 : vector<8x128xf32> to vector<1x8x128xf32>
    tpu.vector_store %arg3[%c0_10, %c0_11, %c0_12], %20 {strides = array<i32>} : memref<3x8x128xf32, #tpu.memory_space<vmem>>, vector<1x8x128xf32>,
    %c1 = arith.constant 1 : index
    %c0_13 = arith.constant 0 : index
    %c0_14 = arith.constant 0 : index
    %21 = vector.load %arg3[%c1, %c0_13, %c0_14] : memref<3x8x128xf32, #tpu.memory_space<vmem>>, vector<1x8x128xf32>
    %22 = vector.shape_cast %21 : vector<1x8x128xf32> to vector<8x128xf32>
    %23 = vector.shape_cast %11 : vector<16x128xf32> to vector<2x8x128xf32>
    %cst_15 = arith.constant dense<0.000000e+00> : vector<8x128xf32>
    %24 = vector.multi_reduction <add>, %23, %cst_15 [0] : vector<2x8x128xf32> to vector<8x128xf32>
    %25 = arith.addf %22, %24 : vector<8x128xf32>
    %c1_16 = arith.constant 1 : index
    %c0_17 = arith.constant 0 : index
    %c0_18 = arith.constant 0 : index
    %26 = vector.load %arg3[%c1_16, %c0_17, %c0_18] : memref<3x8x128xf32, #tpu.memory_space<vmem>>, vector<1x8x128xf32>
    %27 = vector.shape_cast %26 : vector<1x8x128xf32> to vector<8x128xf32>
    %28 = vector.shape_cast %25 : vector<8x128xf32> to vector<1x8x128xf32>
    tpu.vector_store %arg3[%c1_16, %c0_17, %c0_18], %28 {strides = array<i32>} : memref<3x8x128xf32, #tpu.memory_space<vmem>>, vector<1x8x128xf32>,
    %c2 = arith.constant 2 : index
    %c0_19 = arith.constant 0 : index
    %c0_20 = arith.constant 0 : index
    %29 = vector.load %arg3[%c2, %c0_19, %c0_20] : memref<3x8x128xf32, #tpu.memory_space<vmem>>, vector<1x8x128xf32>
    %30 = vector.shape_cast %29 : vector<1x8x128xf32> to vector<8x128xf32>
    %31 = vector.shape_cast %4 : vector<16x128xf32> to vector<2x8x128xf32>
    %cst_21 = arith.constant dense<0.000000e+00> : vector<8x128xf32>
    %32 = vector.multi_reduction <add>, %31, %cst_21 [0] : vector<2x8x128xf32> to vector<8x128xf32>
    %33 = arith.addf %30, %32 : vector<8x128xf32>
    %c2_22 = arith.constant 2 : index
    %c0_23 = arith.constant 0 : index
    %c0_24 = arith.constant 0 : index
    %34 = vector.load %arg3[%c2_22, %c0_23, %c0_24] : memref<3x8x128xf32, #tpu.memory_space<vmem>>, vector<1x8x128xf32>
    %35 = vector.shape_cast %34 : vector<1x8x128xf32> to vector<8x128xf32>
    %36 = vector.shape_cast %33 : vector<8x128xf32> to vector<1x8x128xf32>
    tpu.vector_store %arg3[%c2_22, %c0_23, %c0_24], %36 {strides = array<i32>} : memref<3x8x128xf32, #tpu.memory_space<vmem>>, vector<1x8x128xf32>,
    return
  }
  func.func @transform_0(%arg0: i32) -> (i32, i32) {
    %c0_i32 = arith.constant 0 : i32
    %c0_i32_0 = arith.constant 0 : i32
    return %arg0, %c0_i32 : i32, i32
  }
  func.func @transform_1(%arg0: i32) -> (i32, i32) {
    %c0_i32 = arith.constant 0 : i32
    %c0_i32_0 = arith.constant 0 : i32
    return %arg0, %c0_i32 : i32, i32
  }
  func.func @transform_2(%arg0: i32) -> (i32, i32, i32) {
    %c0_i32 = arith.constant 0 : i32
    %c0_i32_0 = arith.constant 0 : i32
    %c0_i32_1 = arith.constant 0 : i32
    %c0_i32_2 = arith.constant 0 : i32
    return %c0_i32, %c0_i32_0, %c0_i32_1 : i32, i32, i32
  }
}

</mosaic_0001>

<bundles_post_ra>
// kernel: tpu_custom_call.1
= control target key start
LH: loop header
LB: loop body
LE: loop exit
PB: predicated region body
PF: predicated region fallthrough
CT: control target
= control target key end

     0   :  { %7 = vsyncpa [#allocation3], 0  ;;  %s207_s0 = inlined_call_operand.hbm [shape: f32[16,128], index: 0, kind: input, shape index: {}]   ;;  %s208_s1 = inlined_call_operand.hbm [shape: f32[16,128], index: 1, kind: input, shape index: {}]   ;;  %s209_s2 = inlined_call_operand.hbm [shape: f32[3,8,128], index: 2, kind: output, shape index: {}]  }
   0x1   :  { %8 = vsyncpa [#allocation6], 0 }
   0x2   :  { %9 = vsyncpa [#allocation4], 0  ;;  %s169_s9 = smov [#allocation2]  }
   0x3   :  { %s15_s10 = sshll.u32 %s169_s9, 4  ;;  %s16_s10 = int_to_ptr.vmem [resolvable:$true] %s15_s10 }
   0x4   :  { %s111_s11 = scalar_lea.vmem %s16_s10, 256  ;;  %p116_p1 = scmp.lt.s32.totalorder %s16_s10, %s16_s10 }
   0x5   :  { %p112_p0 = scmp.ne.s32.totalorder %s16_s10, %s111_s11  ;;  %p117_p2 = scmp.lt.s32.totalorder %s111_s11, %s111_s11 }
   0x7   :  { %p118_p3 = por %p117_p2, %p116_p1 }
   0x9   :  { %p119_p4 = pnand %p118_p3, %p112_p0 }
   0xb   :  { %122 = shalt.err (!%p119_p4)
}
   0xc   :  { %s170_s12 = smov 128   ;;  %s171_s13 = smov 8  }
   0xd   :  { %21 = dma.hbm_to_vmem [thread:$0]  %s207_s0, 256, %s16_s10, [#allocation3], %s170_s12, %s170_s12, %s171_s13  }
   0xe   :  { %s172_s16 = smov [#allocation5]  }
   0xf   :  { %s27_s17 = sshll.u32 %s172_s16, 4  ;;  %s28_s17 = int_to_ptr.vmem [resolvable:$true] %s27_s17 }
  0x10   :  { %s131_s18 = scalar_lea.vmem %s28_s17, 256  ;;  %p136_p6 = scmp.lt.s32.totalorder %s28_s17, %s28_s17 }
  0x11   :  { %p132_p5 = scmp.ne.s32.totalorder %s28_s17, %s131_s18  ;;  %p137_p7 = scmp.lt.s32.totalorder %s131_s18, %s131_s18 }
  0x13   :  { %p138_p8 = por %p137_p7, %p136_p6 }
  0x15   :  { %p139_p9 = pnand %p138_p8, %p132_p5 }
  0x17   :  { %142 = shalt.err (!%p139_p9)
}
  0x18   :  { %33 = dma.hbm_to_vmem [thread:$0]  %s208_s1, 256, %s28_s17, [#allocation6], %s170_s12, %s170_s12, %s171_s13  }
  0x19   :  { %163 = dma.done.wait [#allocation3], 256  }
  0x1a   :  { %164 = vsyncadd [#allocation3], 4294967040 }
  0x1b   :  { %165 = dma.done.wait [#allocation6], 256  }
  0x1c   :  { %166 = vsyncadd [#allocation6], 4294967040  ;;  %v47_v0 = vld [vmem:[#allocation2] sm:$0xff]  ;;  %v48_v1 = vld [vmem:[#allocation2 + $0x8] sm:$0xff]  ;;  %s173_s0 = smov [#allocation7]  }
  0x1d   :  { %v49_v2 = vld [vmem:[#allocation5] sm:$0xff]  ;;  %v50_v3 = vld [vmem:[#allocation5 + $0x8] sm:$0xff]  ;;  %v51_v4 = vmul.f32 0.5, %v47_v0  ;;  %v52_v5 = vmul.f32 0.5, %v48_v1  ;;  %s80_s1 = sshll.u32 %s173_s0, 4  ;;  %s81_s1 = int_to_ptr.vmem [resolvable:$true] %s80_s1 }
  0x1e   :  { %v72_v6 = vadd.f32 %v50_v3, %v49_v2  ;;  %s143_s21 = scalar_lea.vmem %s81_s1, 384  ;;  %p148_p11 = scmp.lt.s32.totalorder %s81_s1, %s81_s1 }
  0x1f   :  { %99 = vtanh.f32 %v51_v4  ;;  %p144_p10 = scmp.ne.s32.totalorder %s81_s1, %s143_s21  ;;  %p149_p12 = scmp.lt.s32.totalorder %s143_s21, %s143_s21 }
  0x20   :  { %101 = vtanh.f32 %v52_v5  ;;  %74 = vst [vmem:[#allocation7 + $0x10] sm:$0xff] %v72_v6 }
  0x21   :  { %p150_p13 = por %p149_p12, %p148_p11 }
  0x23   :  { %p151_p0 = pnand %p150_p13, %p144_p10 }
  0x2c   :  { %v100_v7 = vpop.eup %99 }
  0x2d   :  { %v102_v8 = vpop.eup %101  ;;  %v55_v9 = vadd.f32 1.0, %v100_v7 }
  0x2e   :  { %v56_v10 = vadd.f32 1.0, %v102_v8 }
  0x2f   :  { %v57_v11 = vmul.f32 0.5, %v55_v9 }
  0x30   :  { %v58_v12 = vmul.f32 0.5, %v56_v10 }
  0x31   :  { %v60_v13 = vmul.f32 %v57_v11, %v49_v2 }
  0x32   :  { %v61_v14 = vmul.f32 %v58_v12, %v50_v3  ;;  %v67_v15 = vadd.f32 %v58_v12, %v57_v11 }
  0x34   :  { %v62_v16 = vadd.f32 %v61_v14, %v60_v13  ;;  %69 = vst [vmem:[#allocation7 + $0x8] sm:$0xff] %v67_v15 }
  0x36   :  { %64 = vst [vmem:[#allocation7] sm:$0xff] %v62_v16 }
  0x37   :  { %154 = shalt.err (!%p151_p0)
}
  0x38   :  { %86 = dma.vmem_to_hbm [thread:$0]  %s81_s1, 384, %s209_s2, [#allocation4], %s170_s12, %s170_s12, %s171_s13  }
  0x39   :  { %167 = dma.done.wait [#allocation4], 384  }
  0x3a   :  { %168 = vsyncadd [#allocation4], 4294966912 }
  0x3b   :  { %90 = vsyncpa [#allocation3], 1 }
  0x3c   :  { %91 = vsyncpa [#allocation6], 1 }
  0x3d   :  { %92 = vsyncpa [#allocation4], 1 }

</bundles_post_ra>
